<compile_context>
chip_gen: v7x
topology: tpu7x:2x2x1
jax: 0.10.0
libtpu: 0.0.40
codegen_flags: <defaults>
</compile_context>

<pallas_src>
import functools

import jax
import jax.numpy as jnp
from jax.experimental import pallas as pl
from jax.experimental.pallas import tpu as pltpu


# ------------------------- tiled linear (MXU) kernels -------------------------

def _matmul_kernel(x_ref, w_ref, o_ref):
    o_ref[...] = jnp.dot(
        x_ref[...], w_ref[...], preferred_element_type=jnp.float32
    ).astype(o_ref.dtype)


def _matmul_bias_kernel(x_ref, w_ref, b_ref, o_ref):
    y = jnp.dot(x_ref[...], w_ref[...], preferred_element_type=jnp.float32)
    o_ref[...] = (y + b_ref[...]).astype(o_ref.dtype)


def linear_pallas(x2d, w, b=None, *, out_dtype=jnp.float32, tm=256):
    """x2d: (M, K); w: (K, N) (already transposed from torch (N, K)); b: (1, N)."""
    M, K = x2d.shape
    N = w.shape[1]
    tm = M if M <= tm else tm          # row tiling; weight block stays resident
    grid = (pl.cdiv(M, tm),)
    x_spec = pl.BlockSpec((tm, K), lambda i: (i, 0))
    w_spec = pl.BlockSpec((K, N), lambda i: (0, 0))
    o_spec = pl.BlockSpec((tm, N), lambda i: (i, 0))
    out_shape = jax.ShapeDtypeStruct((M, N), out_dtype)
    cp = pltpu.CompilerParams(dimension_semantics=("parallel",))
    if b is None:
        return pl.pallas_call(
            _matmul_kernel, out_shape=out_shape, grid=grid,
            in_specs=[x_spec, w_spec], out_specs=o_spec, compiler_params=cp,
        )(x2d, w)
    b_spec = pl.BlockSpec((1, N), lambda i: (0, 0))
    return pl.pallas_call(
        _matmul_bias_kernel, out_shape=out_shape, grid=grid,
        in_specs=[x_spec, w_spec, b_spec], out_specs=o_spec, compiler_params=cp,
    )(x2d, w, b)


# ----------------------- flash-style attention kernel -------------------------

def _flash_attn_kernel(q_ref, k_ref, v_ref, bias_ref, o_ref,
                       m_sc, l_sc, acc_sc, *, heads):
    ki = pl.program_id(2)

    @pl.when(ki == 0)
    def _():
        m_sc[...] = jnp.full_like(m_sc, -jnp.inf)
        l_sc[...] = jnp.zeros_like(l_sc)
        acc_sc[...] = jnp.zeros_like(acc_sc)

    q = q_ref[0]        # (tq, H, D) bf16, pre-scaled by dim_head**-0.5
    k = k_ref[0]        # (tk, H, D) bf16
    v = v_ref[0]        # (tk, H, D) bf16
    bias = bias_ref[0]  # (H, tq, tk) f32, pre-scaled relative-position bias

    for h in range(heads):          # static unroll over heads
        q_h = q[:, h, :]            # (tq, D)
        k_h = k[:, h, :]            # (tk, D)
        v_h = v[:, h, :]            # (tk, D)

        # content logits on the MXU; contract last axes directly (no .T / vxpose)
        s = jax.lax.dot_general(
            q_h, k_h, (((1,), (1,)), ((), ())),
            preferred_element_type=jnp.float32)          # (tq, tk) f32
        s = s + bias[h]

        # online (flash) softmax update, all statistics in f32
        m_prev = m_sc[h]                                  # (tq, 1)
        m_new = jnp.maximum(m_prev, jnp.max(s, axis=-1, keepdims=True))
        alpha = jnp.exp(m_prev - m_new)
        p = jnp.exp(s - m_new)
        l_sc[h] = alpha * l_sc[h] + jnp.sum(p, axis=-1, keepdims=True)
        acc_sc[h] = alpha * acc_sc[h] + jax.lax.dot_general(
            p.astype(v_h.dtype), v_h, (((1,), (0,)), ((), ())),
            preferred_element_type=jnp.float32)
        m_sc[h] = m_new

    @pl.when(ki == pl.num_programs(2) - 1)
    def _():
        outs = []
        for h in range(heads):
            inv_l = pl.reciprocal(l_sc[h], approx=True)   # EUP, off the VALU
            outs.append((acc_sc[h] * inv_l).astype(o_ref.dtype))
        # lane-dense store: heads concatenated on the lane axis -> (tq, H*D)
        o_ref[0] = jnp.concatenate(outs, axis=-1)


def attention_core_pallas(q, k, v, bias, *, tq, tk):
    """q/k/v: (B, N, H, D) bf16 (q pre-scaled); bias: (B, H, N, N) f32.
    Returns (B, N, H*D) bf16 (heads concatenated, lane-dense)."""
    B, N, H, D = q.shape
    assert N % tq == 0 and N % tk == 0
    assert tq % 8 == 0 or tq == N
    assert tk % 128 == 0 or tk == N     # bias tile: last dim must be lane-aligned

    kern = functools.partial(_flash_attn_kernel, heads=H)
    grid = (B, N // tq, N // tk)        # reduction (k) axis last
    return pl.pallas_call(
        kern,
        out_shape=jax.ShapeDtypeStruct((B, N, H * D), jnp.bfloat16),
        grid=grid,
        in_specs=[
            pl.BlockSpec((1, tq, H, D), lambda b, qi, ki: (b, qi, 0, 0)),
            pl.BlockSpec((1, tk, H, D), lambda b, qi, ki: (b, ki, 0, 0)),
            pl.BlockSpec((1, tk, H, D), lambda b, qi, ki: (b, ki, 0, 0)),
            pl.BlockSpec((1, H, tq, tk), lambda b, qi, ki: (b, 0, qi, ki)),
        ],
        out_specs=pl.BlockSpec((1, tq, H * D), lambda b, qi, ki: (b, qi, 0)),
        scratch_shapes=[
            pltpu.VMEM((H, tq, 1), jnp.float32),   # m (running max)
            pltpu.VMEM((H, tq, 1), jnp.float32),   # l (running denom)
            pltpu.VMEM((H, tq, D), jnp.float32),   # acc
        ],
        compiler_params=pltpu.CompilerParams(
            dimension_semantics=("parallel", "parallel", "arbitrary")),
    )(q, k, v, bias)


# ------------------------------ full forward --------------------------------

def attention_forward(x, params, heads, dim_head, max_pos_emb, *, tq=None, tk=None):
    """x: (T, B, dim) -> (T, B, dim). Eval-mode path (mask=None, context=None)."""
    T, B, dim = x.shape
    inner = heads * dim_head
    R = 2 * max_pos_emb + 1
    scale = dim_head ** (-0.5)

    # Fold the softmax scale into the Q projection, and fold the relative positional
    # embedding into the same fused projection (Shaw formulation):
    #   pe[b, t, h, r] = scale * (q[b, t, h, :] . rel_pos_emb[r, :])
    wq_s = params["wq_t"] * scale                                     # (dim, inner)
    wpe = jnp.einsum("chd,rd->chr",
                     wq_s.reshape(dim, heads, dim_head),
                     params["rel_pos_emb"]).reshape(dim, heads * R)   # (dim, H*R)
    w_all = jnp.concatenate([wq_s, params["wkv_t"], wpe], axis=1)     # (dim, 3*inner+H*R)

    xb = jnp.transpose(x, (1, 0, 2))              # (B, T, dim)
    x2d = xb.reshape(B * T, dim)

    # one fused MXU matmul produces Q, K, V and the positional scores
    proj = linear_pallas(x2d.astype(jnp.bfloat16), w_all.astype(jnp.bfloat16),
                         out_dtype=jnp.float32)   # (B*T, 3*inner + H*R)

    def to_bthd(cols):                            # contiguous reshape, no transpose
        return cols.reshape(B, T, heads, dim_head).astype(jnp.bfloat16)

    q = to_bthd(proj[:, :inner])                  # (B, T, H, D), pre-scaled
    k = to_bthd(proj[:, inner:2 * inner])
    v = to_bthd(proj[:, 2 * inner:3 * inner])
    pe = proj[:, 3 * inner:].reshape(B, T, heads, R)      # f32, pre-scaled

    # relative-position bias: gather (T, R) scores into the (T, T) bias (XLA glue)
    seq = jnp.arange(T)
    dist = (jnp.clip(seq[:, None] - seq[None, :], -max_pos_emb, max_pos_emb)
            + max_pos_emb)                                 # (T, T) int32
    pe_bhtr = jnp.transpose(pe, (0, 2, 1, 3))              # (B, H, T, R)
    idx = jnp.broadcast_to(dist[None, None, :, :], (B, heads, T, T))
    bias = jnp.take_along_axis(pe_bhtr, idx, axis=-1)      # (B, H, T, T) f32

    if tq is None:
        tq = 256 if (T > 256 and T % 256 == 0) else T
    if tk is None:
        tk = 512 if (T > 512 and T % 512 == 0) else T

    out_bt = attention_core_pallas(q, k, v, bias, tq=tq, tk=tk)   # (B, T, H*D) bf16
    out2d = out_bt.reshape(B * T, inner)                   # contiguous (free) reshape
    out2d = linear_pallas(out2d, params["wo_t"].astype(jnp.bfloat16),
                          params["bo"], out_dtype=jnp.float32)    # (B*T, dim)
    out = out2d.reshape(B, T, dim)
    # TODO(synk): optional mask/context paths and train-mode dropout not implemented
    # (module is exercised with mask=None, context=None; nn.Dropout eval == identity).
    return jnp.transpose(out, (1, 0, 2))                   # (T, B, dim)


# ------------------------------- pure-JAX ref --------------------------------

def reference_forward(x, params, heads, dim_head, max_pos_emb):
    T, B, dim = x.shape
    inner = heads * dim_head
    xb = jnp.transpose(x, (1, 0, 2))
    q = xb @ params["wq_t"]
    kv = xb @ params["wkv_t"]
    k, v = kv[..., :inner], kv[..., inner:]

    def split(t):
        return jnp.transpose(t.reshape(B, T, heads, dim_head), (0, 2, 1, 3))

    q, k, v = split(q), split(k), split(v)
    scale = dim_head ** (-0.5)
    dots = jnp.einsum("bhid,bhjd->bhij", q, k) * scale
    seq = jnp.arange(T)
    dist = jnp.clip(seq[:, None] - seq[None, :], -max_pos_emb, max_pos_emb) + max_pos_emb
    rel = params["rel_pos_emb"][dist]
    pos = jnp.einsum("bhnd,nrd->bhnr", q, rel) * scale
    attn = jax.nn.softmax(dots + pos, axis=-1)
    out = jnp.einsum("bhij,bhjd->bhid", attn, v)
    out = jnp.transpose(out, (0, 2, 1, 3)).reshape(B, T, inner)
    out = out @ params["wo_t"] + params["bo"]
    return jnp.transpose(out.reshape(B, T, dim), (1, 0, 2))


# ---------------------------------- main -------------------------------------

if __name__ == "__main__":
    dim, heads, dim_head, max_pos_emb = 32, 4, 16, 16
    T, B = 16, 2
    inner = heads * dim_head

    key = jax.random.PRNGKey(0)
    keys = jax.random.split(key, 6)
    params = {
        # weights stored pre-transposed: (in, out) so kernels compute x @ W_t
        "wq_t": 0.05 * jax.random.normal(keys[0], (dim, inner), jnp.float32),
        "wkv_t": 0.05 * jax.random.normal(keys[1], (dim, 2 * inner), jnp.float32),
        "wo_t": 0.05 * jax.random.normal(keys[2], (inner, dim), jnp.float32),
        "bo": 0.05 * jax.random.normal(keys[3], (1, dim), jnp.float32),
        "rel_pos_emb": 0.05 * jax.random.normal(
            keys[4], (2 * max_pos_emb + 1, dim_head), jnp.float32),
    }
    x = jax.random.normal(keys[5], (T, B, dim), jnp.float32)

    # tq=8 exercises q-tiling; tk=T keeps the bias tile lane-legal at this toy size
    out = attention_forward(x, params, heads, dim_head, max_pos_emb, tq=8, tk=T)
    out = jax.block_until_ready(out)

    ref = reference_forward(x, params, heads, dim_head, max_pos_emb)
    assert out.shape == (T, B, dim)
    max_err = float(jnp.max(jnp.abs(out - ref)))
    # bf16 MXU inputs + approximate reciprocal => expect a few e-3 absolute error
    assert max_err < 2e-2, f"mismatch vs reference: {max_err}"

    print("KERNEL_OK")
</pallas_src>

<mosaic_0001>
module attributes {stable_mosaic.version = 11 : i64} {
  func.func @_matmul_kernel(%arg0: i32, %arg1: memref<32x32xbf16, #tpu.memory_space<vmem>>, %arg2: memref<32x324xbf16, #tpu.memory_space<vmem>>, %arg3: memref<32x324xf32, #tpu.memory_space<vmem>>) attributes {dimension_semantics = [#tpu.dimension_semantics<parallel>], iteration_bounds = array<i64: 1>, scalar_prefetch = 0 : i64, scratch_operands = 0 : i64, tpu.core_type = #tpu.core_type<tc>, window_params = [{transform_indices = @transform_0, window_bounds = array<i64: 32, 32>}, {pipeline_mode = #tpu.pipeline_mode<synchronous>, transform_indices = @transform_1, window_bounds = array<i64: 32, 324>}, {transform_indices = @transform_2, window_bounds = array<i64: 32, 324>}]} {
    %c0 = arith.constant 0 : index
    %c0_0 = arith.constant 0 : index
    %0 = vector.load %arg1[%c0, %c0_0] : memref<32x32xbf16, #tpu.memory_space<vmem>>, vector<32x32xbf16>
    %c0_1 = arith.constant 0 : index
    %c0_2 = arith.constant 0 : index
    %1 = vector.load %arg2[%c0_1, %c0_2] : memref<32x324xbf16, #tpu.memory_space<vmem>>, vector<32x324xbf16>
    %cst = arith.constant dense<0.000000e+00> : vector<32x324xf32>
    %2 = tpu.matmul %0, %1, %cst {dimension_numbers = #tpu.dot_dimension_numbers<[1], [0], [0], [1], [0, 0, 1, 1], [], []>} : vector<32x32xbf16>, vector<32x324xbf16>, vector<32x324xf32> -> vector<32x324xf32>
    %c0_3 = arith.constant 0 : index
    %c0_4 = arith.constant 0 : index
    %3 = vector.load %arg3[%c0_3, %c0_4] : memref<32x324xf32, #tpu.memory_space<vmem>>, vector<32x324xf32>
    tpu.vector_store %arg3[%c0_3, %c0_4], %2 {strides = array<i32>} : memref<32x324xf32, #tpu.memory_space<vmem>>, vector<32x324xf32>,
    return
  }
  func.func @transform_0(%arg0: i32) -> (i32, i32) {
    %c0_i32 = arith.constant 0 : i32
    %c0_i32_0 = arith.constant 0 : i32
    return %arg0, %c0_i32 : i32, i32
  }
  func.func @transform_1(%arg0: i32) -> (i32, i32) {
    %c0_i32 = arith.constant 0 : i32
    %c0_i32_0 = arith.constant 0 : i32
    %c0_i32_1 = arith.constant 0 : i32
    return %c0_i32, %c0_i32_0 : i32, i32
  }
  func.func @transform_2(%arg0: i32) -> (i32, i32) {
    %c0_i32 = arith.constant 0 : i32
    %c0_i32_0 = arith.constant 0 : i32
    return %arg0, %c0_i32 : i32, i32
  }
}

</mosaic_0001>

<bundles_post_ra>
// kernel: tpu_custom_call.1
= control target key start
LH: loop header
LB: loop body
LE: loop exit
PB: predicated region body
PF: predicated region fallthrough
CT: control target
= control target key end

     0   :  { %7 = vsyncpa [#allocation3], 0  ;;  %s412_s0 = inlined_call_operand.hbm [shape: bf16[32,32], index: 0, kind: input, shape index: {}]   ;;  %s413_s1 = inlined_call_operand.hbm [shape: bf16[32,324], index: 1, kind: input, shape index: {}]   ;;  %s414_s2 = inlined_call_operand.hbm [shape: f32[32,324], index: 2, kind: output, shape index: {}]  }
   0x1   :  { %8 = vsyncpa [#allocation6], 0 }
   0x2   :  { %9 = vsyncpa [#allocation4], 0  ;;  %s351_s9 = smov [#allocation2]   ;;  %s279_s13 = scalar_lea.hbm %s412_s0, 256 }
   0x3   :  { %s15_s10 = sshll.u32 %s351_s9, 4  ;;  %p280_p0 = scmp.ne.s32.totalorder %s412_s0, %s279_s13  ;;  %s16_s10 = int_to_ptr.vmem [resolvable:$true] %s15_s10 }
   0x4   :  { %p283_p1 = scmp.lt.u32.totalorder %s279_s13, %s412_s0 }
   0x6   :  { %p285_p2 = pnand %p283_p1, %p280_p0 }
   0x8   :  { %288 = shalt.err (!%p285_p2)
}
   0x9   :  { %s289_s18 = scalar_lea.vmem %s16_s10, 256  ;;  %p294_p4 = scmp.lt.s32.totalorder %s16_s10, %s16_s10 }
   0xa   :  { %p290_p3 = scmp.ne.s32.totalorder %s16_s10, %s289_s18  ;;  %p295_p5 = scmp.lt.s32.totalorder %s289_s18, %s289_s18 }
   0xc   :  { %p296_p6 = por %p295_p5, %p294_p4 }
   0xe   :  { %p297_p7 = pnand %p296_p6, %p290_p3 }
  0x10   :  { %300 = shalt.err (!%p297_p7)
}
  0x11   :  { %s352_s19 = smov 64   ;;  %s353_s20 = smov 4  }
  0x12   :  { %21 = dma.hbm_to_vmem [thread:$0]  %s412_s0, 256, %s16_s10, [#allocation3], %s352_s19, %s352_s19, %s353_s20  }
  0x13   :  { %s354_s23 = smov [#allocation5]   ;;  %s301_s27 = scalar_lea.hbm %s413_s1, 768 }
  0x14   :  { %s27_s24 = sshll.u32 %s354_s23, 4  ;;  %p302_p8 = scmp.ne.s32.totalorder %s413_s1, %s301_s27  ;;  %s28_s24 = int_to_ptr.vmem [resolvable:$true] %s27_s24 }
  0x15   :  { %p305_p9 = scmp.lt.u32.totalorder %s301_s27, %s413_s1 }
  0x17   :  { %p307_p10 = pnand %p305_p9, %p302_p8 }
  0x19   :  { %310 = shalt.err (!%p307_p10)
}
  0x1a   :  { %s311_s4 = scalar_lea.vmem %s28_s24, 768  ;;  %p316_p12 = scmp.lt.s32.totalorder %s28_s24, %s28_s24 }
  0x1b   :  { %p312_p11 = scmp.ne.s32.totalorder %s28_s24, %s311_s4  ;;  %p317_p13 = scmp.lt.s32.totalorder %s311_s4, %s311_s4 }
  0x1d   :  { %p318_p0 = por %p317_p13, %p316_p12 }
  0x1f   :  { %p319_p1 = pnand %p318_p0, %p312_p11 }
  0x21   :  { %322 = shalt.err (!%p319_p1)
}
  0x22   :  { %s355_s0 = smov 192   ;;  %s356_s5 = smov 12  }
  0x23   :  { %33 = dma.hbm_to_vmem [thread:$0]  %s413_s1, 768, %s28_s24, [#allocation6], %s355_s0, %s355_s0, %s356_s5  }
  0x24   :  { %345 = dma.done.wait [#allocation3], 256  }
  0x25   :  { %346 = vsyncadd [#allocation3], 4294967040 }
  0x26   :  { %347 = dma.done.wait [#allocation6], 768  }
  0x27   :  { %348 = vsyncadd [#allocation6], 4294966528  ;;  %v357_v0 = vmov 0   ;;  %v269_v1 = vld [vmem:[#allocation5 + $0x4] ss:$12 sps:$4 sm:$0xff]   ;;  %vm95_vm0 = vcmask 261120  }
  0x28   :  { %134 = vmatprep.mubr.bf16.mxu0 %v357_v0  ;;  %v271_v2 = vld [vmem:[#allocation5] ss:$12 sps:$4 sm:$0xff]   ;;  %102 = vmatprep.subr.bf16.mxu0 %v269_v1  ;;  %v272_v3 = vld [vmem:[#allocation5 + $0x1c] ss:$12 sps:$4 sm:$0xff]   ;;  %v274_v4 = vld [vmem:[#allocation5 + $0x18] ss:$12 sps:$4 sm:$0xff]  }
  0x29   :  { %103 = vmatpush1.bf16.msra.mxu0 %v271_v2  ;;  %v275_v5 = vld [vmem:[#allocation5 + $0x8] ss:$12 sps:$4 sm:$0xff]   ;;  %v277_v7 = vld [vmem:[#allocation5 + $0x20] ss:$12 sps:$4 sm:$0xff]   ;;  %v278_v8 = vld [vmem:[#allocation2 + $0x8] sm:$0xff]   ;;  %vm206_vm1 = vcmask 556032  }
  0x2a   :  { %104 = vmatprep.subr.bf16.mxu0 %v272_v3  ;;  %v276_v6 = vld [vmem:[#allocation2] sm:$0xff]   ;;  %251 = vmatprep.subr.bf16.mxu1 %v275_v5  ;;  %s358_s1 = smov [#allocation7]  }
  0x2b   :  { %252 = vmatpush3.bf16.msra.mxu1 %v275_v5  ;;  %255 = vmatprep.mubr.msk.bf16.mxu1 %vm95_vm0, %v276_v6  ;;  %s222_s8 = sshll.u32 %s358_s1, 4  ;;  %s223_s8 = int_to_ptr.vmem [resolvable:$true] %s222_s8 }
  0x2c   :  { %253 = vmatprep.subr.bf16.mxu1 %v277_v7  ;;  %s323_s9 = scalar_lea.vmem %s223_s8, 1536  ;;  %p328_p3 = scmp.lt.s32.totalorder %s223_s8, %s223_s8 }
  0x2d   :  { %105 = vmatpush1.bf16.msra.mxu0 %v274_v4  ;;  %p324_p2 = scmp.ne.s32.totalorder %s223_s8, %s323_s9  ;;  %p329_p4 = scmp.lt.s32.totalorder %s323_s9, %s323_s9 }
  0x2f   :  { %254 = vmatpush3.bf16.msra.mxu1 %v277_v7  ;;  %p330_p5 = por %p329_p4, %p328_p3 }
  0x30   :  { %243 = vmatmul.mubr.msk.bf16.vlgmr.msra.gmra.mrb[0].mxu0 %vm95_vm0, %v276_v6 }
  0x31   :  { %144 = vmatprep.mubr.bf16.mxu0 %v357_v0  ;;  %p331_p6 = pnand %p330_p5, %p324_p2 }
  0x32   :  { %256 = vmatmul.mubr.msk.bf16.vlgmr.msra.gmra.mrb[0].mxu1 %vm95_vm0, %v278_v8 }
  0x38   :  { %244 = vmatmul.mubr.msk.bf16.gmra.mrb[4].mxu0 %vm95_vm0, %v278_v8 }
 0x103   :  { %v136_v9 = vpop.f32.mrb[0].mxu0 }
 0x104   :  { %204 = vst [vmem:[#allocation7] sm:$0xff] %v136_v9  ;;  %v138_v10 = vpop.f32.mrb[1].mxu0 }
 0x105   :  { %205 = vst [vmem:[#allocation7 + $0x8] sm:$0xff] %v138_v10  ;;  %v140_v11 = vpop.f32.mrb[2].mxu0  ;;  %v257_v13 = vpop.f32.mrb[0].mxu1 }
 0x106   :  { %208 = vst [vmem:[#allocation7 + $0x18] sm:$0xff] %v140_v11  ;;  %v142_v12 = vpop.f32.mrb[3].mxu0  ;;  %213 = vst.msk [vmem:[#allocation7 + $0x40] sm:$0xff] %vm206_vm1, %v257_v13  ;;  %v189_v14 = vpop.f32.mrb[1].mxu1 }
 0x107   :  { %209 = vst [vmem:[#allocation7 + $0x20] sm:$0xff] %v142_v12  ;;  %207 = vst.msk [vmem:[#allocation7 + $0x10] sm:$0xff] %vm206_vm1, %v189_v14  ;;  %v258_v15 = vpop.f32.mrb[2].mxu1 }
 0x108   :  { %216 = vst.msk [vmem:[#allocation7 + $0x58] sm:$0xff] %vm206_vm1, %v258_v15  ;;  %v192_v16 = vpop.f32.mrb[3].mxu1 }
 0x109   :  { %210 = vst.msk [vmem:[#allocation7 + $0x28] sm:$0xff] %vm206_vm1, %v192_v16 }
 0x10b   :  { %v146_v17 = vpop.f32.mrb[4].mxu0 }
 0x10c   :  { %211 = vst [vmem:[#allocation7 + $0x30] sm:$0xff] %v146_v17  ;;  %v148_v18 = vpop.f32.mrb[5].mxu0 }
 0x10d   :  { %212 = vst [vmem:[#allocation7 + $0x38] sm:$0xff] %v148_v18  ;;  %v150_v19 = vpop.f32.mrb[6].mxu0 }
 0x10e   :  { %214 = vst [vmem:[#allocation7 + $0x48] sm:$0xff] %v150_v19  ;;  %v152_v20 = vpop.f32.mrb[7].mxu0 }
 0x10f   :  { %215 = vst [vmem:[#allocation7 + $0x50] sm:$0xff] %v152_v20 }
 0x110   :  { %334 = shalt.err (!%p331_p6)
}
 0x111   :  { %s335_s12 = scalar_lea.hbm %s414_s2, 1536 }
 0x112   :  { %p336_p7 = scmp.ne.s32.totalorder %s414_s2, %s335_s12  ;;  %p339_p8 = scmp.lt.u32.totalorder %s335_s12, %s414_s2 }
 0x114   :  { %p341_p9 = pnand %p339_p8, %p336_p7 }
 0x116   :  { %344 = shalt.err (!%p341_p9)
}
 0x117   :  { %s359_s17 = smov 384   ;;  %s360_s18 = smov 24  }
 0x118   :  { %228 = dma.vmem_to_hbm [thread:$0]  %s223_s8, 1536, %s414_s2, [#allocation4], %s359_s17, %s359_s17, %s360_s18  }
 0x119   :  { %349 = dma.done.wait [#allocation4], 1536  }
 0x11a   :  { %350 = vsyncadd [#allocation4], 4294965760 }
 0x11b   :  { %232 = vsyncpa [#allocation3], 1 }
 0x11c   :  { %233 = vsyncpa [#allocation6], 1 }
 0x11d   :  { %234 = vsyncpa [#allocation4], 1 }

</bundles_post_ra>
